<compile_context>
chip_gen: v7x
topology: tpu7x:2x2x1
jax: 0.10.0
libtpu: 0.0.40
codegen_flags: <defaults>
</compile_context>

<pallas_src>
import functools

import jax
import jax.numpy as jnp
from jax.experimental import pallas as pl
from jax.experimental.pallas import tpu as pltpu

LANE = 128


def _round_up(x, m):
    return (x + m - 1) // m * m


# ---------------------------------------------------------------------------
# Pallas kernel: one R-GCN layer per grid step, activation carried in VMEM
# ---------------------------------------------------------------------------
def _rgcn_layer_kernel(a_ref, x_ref, w_ref, b_ref, out_ref, act_ref, msg_ref,
                       *, num_rels, n_nodes, d_pad, num_layers):
    """a_ref:   [N, R*N]       bf16  row-normalized A_r blocks (lane-concat)
       x_ref:   [N, D]         bf16  padded node embeddings (layer-0 input)
       w_ref:   [1, D, (R+1)D] bf16  this layer's weights; last D-slice = W_root
       b_ref:   [1, 1, D]      f32   this layer's bias
       out_ref: [N, D]         f32   final-layer output (resident across grid)
       act_ref: [N, D]         bf16  VMEM scratch: activation carried layer->layer
       msg_ref: [R*N, D]       bf16  VMEM scratch: stacked per-relation messages"""
    l = pl.program_id(0)

    @pl.when(l == 0)
    def _():
        act_ref[...] = x_ref[...]

    x = act_ref[...]

    # One wide transform matmul: [N, D] @ [D, (R+1)*D]  (f32 accumulation).
    h_all = jnp.dot(x, w_ref[0], preferred_element_type=jnp.float32)

    # Scatter the R relation messages into the [R*N, D] message slab
    # (static 128-lane slices -> unmasked full-lane stores).
    for r in range(num_rels):
        msg_ref[pl.ds(r * n_nodes, n_nodes), :] = (
            h_all[:, r * d_pad:(r + 1) * d_pad].astype(jnp.bfloat16))

    # Root/self term stays in f32 and bypasses the aggregation matmul.
    root = h_all[:, num_rels * d_pad:(num_rels + 1) * d_pad]

    # Single deep aggregation: sum_r A_r @ (X W_r), contraction depth R*N=256.
    acc = jnp.dot(a_ref[...], msg_ref[...], preferred_element_type=jnp.float32)
    acc = acc + root + b_ref[0]

    @pl.when(l < num_layers - 1)
    def _():
        # ReLU between layers.
        # TODO(synk): F.dropout(x, training=True) (torch RNG) not reproduced;
        # identity in eval mode.
        act_ref[...] = jnp.maximum(acc, 0.0).astype(jnp.bfloat16)

    @pl.when(l == num_layers - 1)
    def _():
        out_ref[...] = acc            # final layer: no activation


# ---------------------------------------------------------------------------
# One-time operand packing (hoisted out of the forward path)
# ---------------------------------------------------------------------------
def pack_rgcn_operands(node_emb, adj, layer_params):
    """node_emb: [N, h_dim] f32; adj: [R, N, N] f32 (row-normalized per rel);
    layer_params: list of (w_rel [R, Din, Dout], w_root [Din, Dout], bias [Dout]).
    Returns prepacked, lane-dense kernel operands; call once per parameter set."""
    N, h_dim = node_emb.shape
    R = adj.shape[0]
    L = len(layer_params)
    out_dim = layer_params[-1][1].shape[1]
    D = _round_up(max(h_dim, out_dim), LANE)     # lane-dense padded feature dim

    x_pad = jnp.zeros((N, D), jnp.bfloat16).at[:, :h_dim].set(
        node_emb.astype(jnp.bfloat16))

    # a_cat[:, r*N:(r+1)*N] = A_r   (no identity block: root handled in f32)
    a_cat = jnp.transpose(adj, (1, 0, 2)).reshape(N, R * N).astype(jnp.bfloat16)

    # w_cat[l] = [ pad(W_0) | ... | pad(W_{R-1}) | pad(W_root) ]   -> [D, (R+1)*D]
    w_cat = jnp.zeros((L, D, (R + 1) * D), jnp.bfloat16)
    b_all = jnp.zeros((L, 1, D), jnp.float32)
    for l, (w_rel, w_root, bias) in enumerate(layer_params):
        din, dout = w_root.shape
        w_r_pad = jnp.pad(w_rel, ((0, 0), (0, D - din), (0, D - dout)))   # [R,D,D]
        w_root_pad = jnp.pad(w_root, ((0, D - din), (0, D - dout)))       # [D,D]
        slab = jnp.concatenate(
            [jnp.transpose(w_r_pad, (1, 0, 2)).reshape(D, R * D), w_root_pad],
            axis=1)                                                       # [D,(R+1)D]
        w_cat = w_cat.at[l].set(slab.astype(jnp.bfloat16))
        b_all = b_all.at[l, 0, :dout].set(bias.reshape(-1))

    meta = {"out_dim": int(out_dim), "num_rels": int(R), "num_layers": int(L)}
    return a_cat, x_pad, w_cat, b_all, meta


# ---------------------------------------------------------------------------
# Forward: just the pallas_call on prepacked operands
# ---------------------------------------------------------------------------
def rgcn_encoder_forward(packed):
    a_cat, x_pad, w_cat, b_all, meta = packed
    N, D = x_pad.shape
    L = w_cat.shape[0]
    SD = w_cat.shape[2]
    R = meta["num_rels"]
    out_dim = meta["out_dim"]

    kernel = functools.partial(_rgcn_layer_kernel, num_rels=R, n_nodes=N,
                               d_pad=D, num_layers=L)

    flops = L * (2 * N * D * SD + 2 * N * (R * N) * D)
    bytes_accessed = (N * R * N * 2 + N * D * 2 + L * D * SD * 2
                      + L * D * 4 + N * D * 4)

    out = pl.pallas_call(
        kernel,
        out_shape=jax.ShapeDtypeStruct((N, D), jnp.float32),
        grid_spec=pltpu.PrefetchScalarGridSpec(
            num_scalar_prefetch=0,
            grid=(L,),
            in_specs=[
                pl.BlockSpec((N, R * N), lambda l: (0, 0)),     # A (fetched once)
                pl.BlockSpec((N, D), lambda l: (0, 0)),         # X (fetched once)
                pl.BlockSpec((1, D, SD), lambda l: (l, 0, 0)),  # per-layer weights
                pl.BlockSpec((1, 1, D), lambda l: (l, 0, 0)),   # per-layer bias
            ],
            out_specs=pl.BlockSpec((N, D), lambda l: (0, 0)),   # resident output
            scratch_shapes=[
                pltpu.VMEM((N, D), jnp.bfloat16),       # activation carry
                pltpu.VMEM((R * N, D), jnp.bfloat16),   # stacked messages
            ],
        ),
        compiler_params=pltpu.CompilerParams(
            dimension_semantics=("arbitrary",)),
        cost_estimate=pl.CostEstimate(flops=flops, transcendentals=0,
                                      bytes_accessed=bytes_accessed),
    )(a_cat, x_pad, w_cat, b_all)
    return out[:, :out_dim]


# ---------------------------------------------------------------------------
# Glue: graph -> dense per-relation normalized adjacency, parameter setup
# ---------------------------------------------------------------------------
def build_rel_adjacency(edge_index, edge_type, num_nodes, num_rels):
    """A[r, i, j] = 1/deg_r(i) for each edge j->i of relation r (PyG mean aggr)."""
    # TODO(synk): for realistic graph sizes replace this dense O(R*N^2) form
    # with scalar-prefetched edge/segment indices + DMA gather.
    src, dst = edge_index[0], edge_index[1]
    a = jnp.zeros((num_rels, num_nodes, num_nodes), jnp.float32)
    a = a.at[edge_type, dst, src].add(1.0)
    deg = a.sum(axis=2, keepdims=True)
    return a / jnp.maximum(deg, 1.0)


def glorot(key, shape, fan_in, fan_out):
    a = (6.0 / (fan_in + fan_out)) ** 0.5
    return jax.random.uniform(key, shape, jnp.float32, -a, a)


def block_diag_weights(blocks):
    """[R, B, din_b, dout_b] -> dense block-diagonal [R, B*din_b, B*dout_b]."""
    R, B, dib, dob = blocks.shape
    w = jnp.zeros((R, B * dib, B * dob), blocks.dtype)
    for b in range(B):
        w = w.at[:, b * dib:(b + 1) * dib, b * dob:(b + 1) * dob].set(blocks[:, b])
    return w


def init_rgcn_encoder_params(key, num_nodes, h_dim, out_dim, num_rels,
                             num_h_layers, num_blocks):
    keys = jax.random.split(key, 16)
    k = iter(keys)
    node_emb = glorot(next(k), (num_nodes, h_dim), num_nodes, h_dim)

    layer_params = []
    # first + hidden layers: block-diagonal decomposition (h_dim -> h_dim)
    for _ in range(1 + num_h_layers):
        dib, dob = h_dim // num_blocks, h_dim // num_blocks
        blocks = glorot(next(k), (num_rels, num_blocks, dib, dob), dib, dob)
        w_rel = block_diag_weights(blocks)                     # [R, h, h]
        w_root = glorot(next(k), (h_dim, h_dim), h_dim, h_dim)
        bias = jnp.zeros((h_dim,), jnp.float32)
        layer_params.append((w_rel, w_root, bias))
    # last layer: full per-relation weight (h_dim -> out_dim)
    w_rel = glorot(next(k), (num_rels, h_dim, out_dim), h_dim, out_dim)
    w_root = glorot(next(k), (h_dim, out_dim), h_dim, out_dim)
    bias = jnp.zeros((out_dim,), jnp.float32)
    layer_params.append((w_rel, w_root, bias))
    return node_emb, layer_params


# ---------------------------------------------------------------------------
# Pure-JAX f32 reference (for correctness check)
# ---------------------------------------------------------------------------
def rgcn_encoder_reference(node_emb, adj, layer_params):
    hi = jax.lax.Precision.HIGHEST
    x = node_emb
    n = len(layer_params)
    for i, (w_rel, w_root, bias) in enumerate(layer_params):
        h = jnp.einsum('md,rdo->rmo', x, w_rel, precision=hi)
        agg = jnp.einsum('rnm,rmo->no', adj, h, precision=hi)
        x_new = agg + jnp.dot(x, w_root, precision=hi) + bias[None, :]
        if i < n - 1:
            x_new = jnp.maximum(x_new, 0.0)
        x = x_new
    return x


# ---------------------------------------------------------------------------
if __name__ == "__main__":
    num_nodes, h_dim, out_dim = 64, 40, 16
    num_rels, num_h_layers, num_blocks = 4, 1, 5
    num_edges = 200

    key = jax.random.PRNGKey(0)
    k_graph, k_type, k_params = jax.random.split(key, 3)

    edge_index = jax.random.randint(k_graph, (2, num_edges), 0, num_nodes,
                                    dtype=jnp.int32)
    edge_type = jax.random.randint(k_type, (num_edges,), 0, num_rels,
                                   dtype=jnp.int32)

    node_emb, layer_params = init_rgcn_encoder_params(
        k_params, num_nodes, h_dim, out_dim, num_rels, num_h_layers, num_blocks)

    adj = build_rel_adjacency(edge_index, edge_type, num_nodes, num_rels)

    # One-time packing (hoisted out of the forward path).
    packed = jax.block_until_ready(pack_rgcn_operands(node_emb, adj, layer_params))

    out = rgcn_encoder_forward(packed)
    out = jax.block_until_ready(out)
    assert out.shape == (num_nodes, out_dim), out.shape
    assert jnp.all(jnp.isfinite(out))

    ref = rgcn_encoder_reference(node_emb, adj, layer_params)
    max_err = float(jnp.max(jnp.abs(out - ref)))
    assert max_err < 3e-2, f"max abs error vs f32 reference: {max_err}"
    print("KERNEL_OK")
</pallas_src>

<mosaic_0001>
module attributes {stable_mosaic.version = 11 : i64} {
  func.func @_rgcn_layer_kernel(%arg0: i32, %arg1: memref<64x256xbf16, #tpu.memory_space<vmem>>, %arg2: memref<64x128xbf16, #tpu.memory_space<vmem>>, %arg3: memref<1x128x640xbf16, #tpu.memory_space<vmem>>, %arg4: memref<1x1x128xf32, #tpu.memory_space<vmem>>, %arg5: memref<64x128xf32, #tpu.memory_space<vmem>>, %arg6: memref<64x128xbf16, #tpu.memory_space<vmem>>, %arg7: memref<256x128xbf16, #tpu.memory_space<vmem>>) attributes {dimension_semantics = [#tpu.dimension_semantics<arbitrary>], iteration_bounds = array<i64: 3>, scalar_prefetch = 0 : i64, scratch_operands = 2 : i64, tpu.core_type = #tpu.core_type<tc>, window_params = [{pipeline_mode = #tpu.pipeline_mode<synchronous>, transform_indices = @transform_0, window_bounds = array<i64: 64, 256>}, {pipeline_mode = #tpu.pipeline_mode<synchronous>, transform_indices = @transform_1, window_bounds = array<i64: 64, 128>}, {transform_indices = @transform_2, window_bounds = array<i64: 1, 128, 640>}, {transform_indices = @transform_3, window_bounds = array<i64: 1, 1, 128>}, {pipeline_mode = #tpu.pipeline_mode<synchronous>, transform_indices = @transform_4, window_bounds = array<i64: 64, 128>}]} {
    %c0_i32 = arith.constant 0 : i32
    %0 = arith.cmpi eq, %arg0, %c0_i32 : i32
    %1 = arith.extui %0 : i1 to i32
    %c0_i32_0 = arith.constant 0 : i32
    %2 = arith.cmpi ne, %1, %c0_i32_0 : i32
    scf.if %2 {
      %c0_21 = arith.constant 0 : index
      %c0_22 = arith.constant 0 : index
      %34 = vector.load %arg2[%c0_21, %c0_22] : memref<64x128xbf16, #tpu.memory_space<vmem>>, vector<64x128xbf16>
      %c0_23 = arith.constant 0 : index
      %c0_24 = arith.constant 0 : index
      %35 = vector.load %arg6[%c0_23, %c0_24] : memref<64x128xbf16, #tpu.memory_space<vmem>>, vector<64x128xbf16>
      tpu.vector_store %arg6[%c0_23, %c0_24], %34 {strides = array<i32>} : memref<64x128xbf16, #tpu.memory_space<vmem>>, vector<64x128xbf16>,
    } else {
    }
    %c0 = arith.constant 0 : index
    %c0_1 = arith.constant 0 : index
    %3 = vector.load %arg6[%c0, %c0_1] : memref<64x128xbf16, #tpu.memory_space<vmem>>, vector<64x128xbf16>
    %c0_2 = arith.constant 0 : index
    %c0_3 = arith.constant 0 : index
    %c0_4 = arith.constant 0 : index
    %4 = vector.load %arg3[%c0_2, %c0_3, %c0_4] : memref<1x128x640xbf16, #tpu.memory_space<vmem>>, vector<1x128x640xbf16>
    %5 = vector.shape_cast %4 : vector<1x128x640xbf16> to vector<128x640xbf16>
    %cst = arith.constant dense<0.000000e+00> : vector<64x640xf32>
    %6 = tpu.matmul %3, %5, %cst {dimension_numbers = #tpu.dot_dimension_numbers<[1], [0], [0], [1], [0, 0, 1, 1], [], []>} : vector<64x128xbf16>, vector<128x640xbf16>, vector<64x640xf32> -> vector<64x640xf32>
    %7 = vector.extract_strided_slice %6 {offsets = [0, 0], sizes = [64, 128], strides = [1, 1]} : vector<64x640xf32> to vector<64x128xf32>
    %8 = arith.truncf %7 : vector<64x128xf32> to vector<64x128xbf16>
    %c0_5 = arith.constant 0 : index
    %c0_6 = arith.constant 0 : index
    %9 = vector.load %arg7[%c0_5, %c0_6] : memref<256x128xbf16, #tpu.memory_space<vmem>>, vector<64x128xbf16>
    tpu.vector_store %arg7[%c0_5, %c0_6], %8 {strides = array<i32>} : memref<256x128xbf16, #tpu.memory_space<vmem>>, vector<64x128xbf16>,
    %10 = vector.extract_strided_slice %6 {offsets = [0, 128], sizes = [64, 128], strides = [1, 1]} : vector<64x640xf32> to vector<64x128xf32>
    %11 = arith.truncf %10 : vector<64x128xf32> to vector<64x128xbf16>
    %c64 = arith.constant 64 : index
    %c0_7 = arith.constant 0 : index
    %12 = vector.load %arg7[%c64, %c0_7] : memref<256x128xbf16, #tpu.memory_space<vmem>>, vector<64x128xbf16>
    tpu.vector_store %arg7[%c64, %c0_7], %11 {strides = array<i32>} : memref<256x128xbf16, #tpu.memory_space<vmem>>, vector<64x128xbf16>,
    %13 = vector.extract_strided_slice %6 {offsets = [0, 256], sizes = [64, 128], strides = [1, 1]} : vector<64x640xf32> to vector<64x128xf32>
    %14 = arith.truncf %13 : vector<64x128xf32> to vector<64x128xbf16>
    %c128 = arith.constant 128 : index
    %c0_8 = arith.constant 0 : index
    %15 = vector.load %arg7[%c128, %c0_8] : memref<256x128xbf16, #tpu.memory_space<vmem>>, vector<64x128xbf16>
    tpu.vector_store %arg7[%c128, %c0_8], %14 {strides = array<i32>} : memref<256x128xbf16, #tpu.memory_space<vmem>>, vector<64x128xbf16>,
    %16 = vector.extract_strided_slice %6 {offsets = [0, 384], sizes = [64, 128], strides = [1, 1]} : vector<64x640xf32> to vector<64x128xf32>
    %17 = arith.truncf %16 : vector<64x128xf32> to vector<64x128xbf16>
    %c192 = arith.constant 192 : index
    %c0_9 = arith.constant 0 : index
    %18 = vector.load %arg7[%c192, %c0_9] : memref<256x128xbf16, #tpu.memory_space<vmem>>, vector<64x128xbf16>
    tpu.vector_store %arg7[%c192, %c0_9], %17 {strides = array<i32>} : memref<256x128xbf16, #tpu.memory_space<vmem>>, vector<64x128xbf16>,
    %19 = vector.extract_strided_slice %6 {offsets = [0, 512], sizes = [64, 128], strides = [1, 1]} : vector<64x640xf32> to vector<64x128xf32>
    %c0_10 = arith.constant 0 : index
    %c0_11 = arith.constant 0 : index
    %20 = vector.load %arg1[%c0_10, %c0_11] : memref<64x256xbf16, #tpu.memory_space<vmem>>, vector<64x256xbf16>
    %c0_12 = arith.constant 0 : index
    %c0_13 = arith.constant 0 : index
    %21 = vector.load %arg7[%c0_12, %c0_13] : memref<256x128xbf16, #tpu.memory_space<vmem>>, vector<256x128xbf16>
    %cst_14 = arith.constant dense<0.000000e+00> : vector<64x128xf32>
    %22 = tpu.matmul %20, %21, %cst_14 {dimension_numbers = #tpu.dot_dimension_numbers<[1], [0], [0], [1], [0, 0, 1, 1], [], []>} : vector<64x256xbf16>, vector<256x128xbf16>, vector<64x128xf32> -> vector<64x128xf32>
    %23 = arith.addf %22, %19 : vector<64x128xf32>
    %c0_15 = arith.constant 0 : index
    %c0_16 = arith.constant 0 : index
    %c0_17 = arith.constant 0 : index
    %24 = vector.load %arg4[%c0_15, %c0_16, %c0_17] : memref<1x1x128xf32, #tpu.memory_space<vmem>>, vector<1x1x128xf32>
    %25 = vector.shape_cast %24 : vector<1x1x128xf32> to vector<1x128xf32>
    %26 = vector.broadcast %25 : vector<1x128xf32> to vector<64x128xf32>
    %27 = arith.addf %23, %26 : vector<64x128xf32>
    %c2_i32 = arith.constant 2 : i32
    %28 = arith.cmpi slt, %arg0, %c2_i32 : i32
    %29 = arith.extui %28 : i1 to i32
    %c0_i32_18 = arith.constant 0 : i32
    %30 = arith.cmpi ne, %29, %c0_i32_18 : i32
    scf.if %30 {
      %cst_21 = arith.constant 0.000000e+00 : f32
      %34 = vector.broadcast %cst_21 : f32 to vector<64x128xf32>
      %35 = arith.maximumf %27, %34 : vector<64x128xf32>
      %36 = arith.truncf %35 : vector<64x128xf32> to vector<64x128xbf16>
      %c0_22 = arith.constant 0 : index
      %c0_23 = arith.constant 0 : index
      %37 = vector.load %arg6[%c0_22, %c0_23] : memref<64x128xbf16, #tpu.memory_space<vmem>>, vector<64x128xbf16>
      tpu.vector_store %arg6[%c0_22, %c0_23], %36 {strides = array<i32>} : memref<64x128xbf16, #tpu.memory_space<vmem>>, vector<64x128xbf16>,
    } else {
    }
    %c2_i32_19 = arith.constant 2 : i32
    %31 = arith.cmpi eq, %arg0, %c2_i32_19 : i32
    %32 = arith.extui %31 : i1 to i32
    %c0_i32_20 = arith.constant 0 : i32
    %33 = arith.cmpi ne, %32, %c0_i32_20 : i32
    scf.if %33 {
      %c0_21 = arith.constant 0 : index
      %c0_22 = arith.constant 0 : index
      %34 = vector.load %arg5[%c0_21, %c0_22] : memref<64x128xf32, #tpu.memory_space<vmem>>, vector<64x128xf32>
      tpu.vector_store %arg5[%c0_21, %c0_22], %27 {strides = array<i32>} : memref<64x128xf32, #tpu.memory_space<vmem>>, vector<64x128xf32>,
    } else {
    }
    return
  }
  func.func @transform_0(%arg0: i32) -> (i32, i32) {
    %c0_i32 = arith.constant 0 : i32
    %c0_i32_0 = arith.constant 0 : i32
    %c0_i32_1 = arith.constant 0 : i32
    return %c0_i32, %c0_i32_0 : i32, i32
  }
  func.func @transform_1(%arg0: i32) -> (i32, i32) {
    %c0_i32 = arith.constant 0 : i32
    %c0_i32_0 = arith.constant 0 : i32
    %c0_i32_1 = arith.constant 0 : i32
    return %c0_i32, %c0_i32_0 : i32, i32
  }
  func.func @transform_2(%arg0: i32) -> (i32, i32, i32) {
    %c0_i32 = arith.constant 0 : i32
    %c0_i32_0 = arith.constant 0 : i32
    %c0_i32_1 = arith.constant 0 : i32
    return %arg0, %c0_i32, %c0_i32_0 : i32, i32, i32
  }
  func.func @transform_3(%arg0: i32) -> (i32, i32, i32) {
    %c0_i32 = arith.constant 0 : i32
    %c0_i32_0 = arith.constant 0 : i32
    %c0_i32_1 = arith.constant 0 : i32
    return %arg0, %c0_i32, %c0_i32_0 : i32, i32, i32
  }
  func.func @transform_4(%arg0: i32) -> (i32, i32) {
    %c0_i32 = arith.constant 0 : i32
    %c0_i32_0 = arith.constant 0 : i32
    %c0_i32_1 = arith.constant 0 : i32
    return %c0_i32, %c0_i32_0 : i32, i32
  }
}

</mosaic_0001>

<bundles_post_ra>
// kernel: tpu_custom_call.1
= control target key start
LH: loop header
LB: loop body
LE: loop exit
PB: predicated region body
PF: predicated region fallthrough
CT: control target
= control target key end

     0   :  { %9 = vsyncpa [#allocation5], 0  ;;  %s1812_s0 = inlined_call_operand.hbm [shape: bf16[64,256], index: 0, kind: input, shape index: {}]   ;;  %s1813_s1 = inlined_call_operand.hbm [shape: bf16[64,128], index: 1, kind: input, shape index: {}]   ;;  %s1814_s2 = inlined_call_operand.hbm [shape: bf16[3,128,640], index: 2, kind: input, shape index: {}]   ;;  %s1815_s3 = inlined_call_operand.vmem [shape: f32[3,1,128], index: 3, kind: input, shape index: {}]   ;;  %s1816_s4 = inlined_call_operand.hbm [shape: f32[64,128], index: 4, kind: output, shape index: {}]  }
   0x1   :  { %10 = vsyncpa [#allocation8], 0 }
   0x2   :  { %11 = vsyncpa [#allocation6], 0  ;;  %s1546_s15 = smov 0   ;;  %s1548_s16 = smov 0  }
   0x3   :  { %s1550_s17 = smov 0   ;;  %s1552_s18 = smov 0  }
   0x4 LB: > { %s1565_s19 = sadd.s32 4294967295, %s1506_s18   ;;  %s1568_s20 = sadd.s32 1, %s1506_s18   ;;  %s1506_s18 = sphi %s1552_s18, %s1837_s18   ;;  %s1502_s17 = sphi %s1550_s17, %s1836_s17   ;;  %s1498_s16 = sphi %s1548_s16, %s1835_s16   ;;  %s1494_s15 = sphi %s1546_s15, %s1834_s15  }
   0x5   : > { %s63_s21 = ssub.s32 %s1506_s18, %s1568_s20  ;;  %s66_s22 = sadd.s32 1, %s1502_s17 }
   0x6   : > { %p64_p0 = scmp.eq.s32.totalorder %s63_s21, 0  ;;  %p73_p1 = scmp.ne.s32.totalorder %s1502_s17, %s1498_s16 }
   0x7   : > { %p74_p2 = scmp.eq.s32.totalorder %s1506_s18, 0  ;;  %p79_p3 = scmp.ne.s32.totalorder %s1498_s16, %s1494_s15 }
   0x8   : > { %s1578_s23 = scalar_select %p64_p0, %s1502_s17, %s66_s22  }
   0x9   : > { %p1580_p4 = por %p74_p2, %p73_p1  ;;  %p1817_p5 = scmp.eq.s32.totalorder %s1565_s19, 0 }
   0xa   : > { %p1053_p6 = scmp.ge.s32.totalorder %s1506_s18, 1  ;;  %p137_p7 = scmp.lt.s32.totalorder %s1506_s18, 4 }
   0xb   : > { %p1589_p8 = por %p1817_p5, %p79_p3  ;;  %s1508_s27 = smov [#allocation4]  }
   0xc   : > { %p1594_p10 = pnand %p1053_p6, %p137_p7  ;;  %s149_s28 = sshll.u32 %s1508_s27, 4  ;;  %s150_s28 = int_to_ptr.vmem [resolvable:$true] %s149_s28 }
   0xd   : > { %s1822_s25 = scalar_select %p1589_p8, 1, 0 }
   0xe   : > { %s1823_s26 = scalar_select %p1594_p10, 1, 0 }
   0xf   : > { %p1214_p11 = pneg %p1594_p10  ;;  %p1227_p13 = scmp.lt.s32.totalorder %s1506_s18, 3 }
  0x10   : > { %s1348_s7 = scalar_lea.hbm %s1812_s0, 1024 }
  0x11   : > { %p1602_p12 = pnand %p1214_p11, %p1817_p5  ;;  %p1609_p0 = pnand %p1227_p13, %p1580_p4 }
  0x12   : > { %p1349_p1 = scmp.ne.s32.totalorder %s1812_s0, %s1348_s7  ;;  %p1355_p4 = scmp.lt.u32.totalorder %s1348_s7, %s1812_s0 }
  0x13   : > { %s1825_s30 = scalar_select %p1609_p0, 1, 0 }
  0x14   : > { %p1350_p2 = pneg %p1602_p12 }
  0x16   : > { %p1351_p3 = pnand %p1350_p2, %p1349_p1 }
  0x18   : > { %p1352_p6 = pneg %p1351_p3 }
  0x1a   : > { %p1357_p7 = pnand %p1355_p4, %p1352_p6 }
  0x1c   : > { %1360 = shalt.err (!%p1357_p7)
}
  0x1d   : > { %s1361_s12 = scalar_lea.vmem %s150_s28, 1024  ;;  %p1369_p5 = scmp.lt.s32.totalorder %s150_s28, %s150_s28 }
  0x1e   : > { %p1362_p11 = scmp.ne.s32.totalorder %s150_s28, %s1361_s12  ;;  %p1370_p8 = scmp.lt.s32.totalorder %s1361_s12, %s1361_s12 }
  0x20   : > { %p1364_p13 = pnand %p1362_p11, %p1350_p2  ;;  %p1371_p10 = por %p1370_p8, %p1369_p5 }
  0x22   : > { %p1365_p9 = pneg %p1364_p13 }
  0x24   : > { %p1372_p0 = pnand %p1371_p10, %p1365_p9 }
  0x26   : > { %1375 = shalt.err (!%p1372_p0)
}
  0x27   : > { %s1509_s13 = smov 128   ;;  %s1510_s14 = smov 8  }
  0x28   : > { %1217 = dma.hbm_to_vmem [thread:$0]  (!%p1602_p12), %s1812_s0, 1024, %s150_s28, [#allocation5], %s1509_s13, %s1509_s13, %s1510_s14  }
  0x29   : > { %s1511_s22 = smov [#allocation7]   ;;  %s1376_s6 = scalar_lea.hbm %s1813_s1, 512 }
  0x2a   : > { %s162_s24 = sshll.u32 %s1511_s22, 4  ;;  %p1377_p5 = scmp.ne.s32.totalorder %s1813_s1, %s1376_s6  ;;  %s163_s24 = int_to_ptr.vmem [resolvable:$true] %s162_s24 }
  0x2b   : > { %p1383_p10 = scmp.lt.u32.totalorder %s1376_s6, %s1813_s1 }
  0x2c   : > { %p1379_p8 = pnand %p1377_p5, %p1350_p2 }
  0x2e   : > { %p1380_p9 = pneg %p1379_p8 }
  0x30   : > { %p1385_p0 = pnand %p1383_p10, %p1380_p9 }
  0x32   : > { %1388 = shalt.err (!%p1385_p0)
}
  0x33   : > { %s1389_s28 = scalar_lea.vmem %s163_s24, 512  ;;  %p1397_p4 = scmp.lt.s32.totalorder %s163_s24, %s163_s24 }
  0x34   : > { %p1390_p1 = scmp.ne.s32.totalorder %s163_s24, %s1389_s28  ;;  %p1398_p7 = scmp.lt.s32.totalorder %s1389_s28, %s1389_s28 }
  0x36   : > { %p1392_p3 = pnand %p1390_p1, %p1350_p2  ;;  %p1399_p11 = por %p1398_p7, %p1397_p4 }
  0x38   : > { %p1393_p6 = pneg %p1392_p3 }
  0x3a   : > { %p1400_p13 = pnand %p1399_p11, %p1393_p6 }
  0x3c   : > { %1403 = shalt.err (!%p1400_p13)
}
  0x3d   : > { %s1512_s11 = smov 64   ;;  %s1513_s12 = smov 4  }
  0x3e   : > { %1220 = dma.hbm_to_vmem [thread:$0]  (!%p1602_p12), %s1813_s1, 512, %s163_s24, [#allocation8], %s1512_s11, %s1512_s11, %s1513_s12  }
  0x3f   : > { %s176_s15 = sand.u32 1, %s1506_s18   ;;  %s178_s21 = sand.u32 1, %s1502_s17  }
  0x40   : > { %s1197_s22 = smul.u32 320, %s178_s21  ;;  %s1665_s29 = scalar_lea.sflag [#allocation5], %s176_s15 }
  0x41   : > { %s1198_s27 = smul.u32 5120, %s1506_s18  ;;  %p1826_p2 = scmp.ne.s32.totalorder %s1825_s30, 0 }
  0x42   : > { %s180_s8 = scalar_lea.vmem [#allocation9], %s1197_s22  ;;  %s1409_s28 = scalar_lea.hbm %s1814_s2, 15360 }
  0x43   : > { %s1661_s7 = scalar_lea.hbm %s1814_s2, %s1198_s27  ;;  %s187_s9 = sshll.u32 %s180_s8, 4  ;;  %s1663_s9 = int_to_ptr.vmem [resolvable:$true] %s187_s9 }
  0x44   : > { %s1404_s24 = scalar_lea.hbm %s1661_s7, 5120  ;;  %p1406_p5 = pneg %p1826_p2 }
  0x45   : > { %p1405_p12 = scmp.ne.s32.totalorder %s1661_s7, %s1404_s24  ;;  %p1410_p10 = scmp.lt.u32.totalorder %s1661_s7, %s1814_s2 }
  0x46   : > { %p1411_p0 = scmp.lt.u32.totalorder %s1409_s28, %s1404_s24  ;;  %p1413_p3 = scmp.lt.u32.totalorder %s1404_s24, %s1661_s7 }
  0x47   : > { %p1407_p8 = pnand %p1406_p5, %p1405_p12 }
  0x48   : > { %p1412_p1 = por %p1411_p0, %p1410_p10 }
  0x49   : > { %p1408_p9 = pneg %p1407_p8 }
  0x4a   : > { %p1414_p6 = por %p1413_p3, %p1412_p1 }
  0x4c   : > { %p1415_p4 = pnand %p1414_p6, %p1408_p9 }
  0x4e   : > { %1418 = shalt.err (!%p1415_p4)
}
  0x4f   : > { %s1419_s13 = scalar_lea.vmem %s1663_s9, 5120  ;;  %s1514_s14 = smov [#allocation9]  }
  0x50   : > { %p1420_p7 = scmp.ne.s32.totalorder %s1663_s9, %s1419_s13  ;;  %s1424_s15 = sshll.u32 %s1514_s14, 4  ;;  %s1425_s15 = int_to_ptr.vmem [resolvable:$false] %s1424_s15 }
  0x51   : > { %s1426_s21 = scalar_lea.vmem %s1425_s15, 10240  ;;  %p1427_p12 = scmp.lt.s32.totalorder %s1663_s9, %s1425_s15 }
  0x52   : > { %p1422_p11 = pnand %p1420_p7, %p1406_p5  ;;  %p1428_p8 = scmp.lt.s32.totalorder %s1426_s21, %s1419_s13 }
  0x54   : > { %p1423_p13 = pneg %p1422_p11  ;;  %p1429_p10 = por %p1428_p8, %p1427_p12 }
  0x56   : > { %p1430_p0 = pnand %p1429_p10, %p1423_p13 }
  0x58   : > { %1433 = shalt.err (!%p1430_p0)
}
  0x59   : > { %s1515_s22 = smov 320   ;;  %s1516_s27 = smov 20  }
  0x5a   : > { %1224 = dma.hbm_to_vmem [thread:$0]  (!%p1826_p2), %s1661_s7, 5120, %s1663_s9, %s1665_s29, %s1515_s22, %s1515_s22, %s1516_s27  }
  0x5b   : > { %p1827_p5 = scmp.ne.s32.totalorder %s1823_s26, 0 }
  0x5c   : > { %p1828_p9 = scmp.eq.s32.totalorder (!%p1827_p5), %s1565_s19, 0 }
  0x5d   : > { %205 = sbr.rel (%p1827_p5) target bundleno = 699 (0x2bb), region = 36 }
  0x64   : > { %1477 = dma.done.wait (%p1828_p9), [#allocation5], 1024   ;;  %p1829_p1 = pmov %p1828_p9 }
  0x66   : > { %1479 = vsyncadd (%p1829_p1), [#allocation5], 4294966272  ;;  %p1830_p3 = pmov %p1829_p1 }
  0x67   : > { %p1831_p6 = pmov %p1829_p1 }
  0x68   : > { %1481 = dma.done.wait (%p1830_p3), [#allocation8], 512  }
  0x69   : > { %1483 = vsyncadd (%p1831_p6), [#allocation8], 4294966784  ;;  %s215_s30 = sand.u32 1, %s1565_s19   ;;  %s217_s5 = sand.u32 1, %s1498_s16  }
  0x6a   : > { %s1199_s6 = smul.u32 320, %s217_s5  ;;  %s216_s26 = scalar_lea.sflag [#allocation5], %s215_s30 }
  0x6b   : > { %p1832_p2 = scmp.ne.s32.totalorder %s1822_s25, 0 }
  0x6c   : > { %s1705_s7 = scalar_lea.vmem [#allocation9], %s1199_s6 }
  0x6d   : > { %1485 = dma.done.wait (%p1832_p2), %s216_s26, 5120  }
  0x6e   : > { %1487 = vsyncadd (%p1832_p2), %s216_s26, 4294962176  ;;  %p242_p4 = scmp.lt.s32.totalorder %s1565_s19, 2  ;;  %p1833_p7 = scmp.ne.s32.totalorder %s1565_s19, 0 }
  0x6f   : > { %v1276_v0 = vld [vmem:[#allocation7] sm:$0xff] (!%p1833_p7)   ;;  %v1277_v1 = vld [vmem:[#allocation7 + $0x8] sm:$0xff] (!%p1833_p7)   ;;  %v1278_v2 = vld [vmem:[#allocation7 + $0x10] sm:$0xff] (!%p1833_p7)  }
  0x70   : > { %s1713_s8 = scalar_select %p242_p4, %s1565_s19, 2 }
  0x71   : > { %249 = sbr.rel (%p1833_p7) target bundleno = 120 (0x78), region = 52  ;;  %282 = vst [vmem:[#allocation2] sm:$0xff] (!%p1833_p7), %v1276_v0  ;;  %283 = vst [vmem:[#allocation2 + $0x8] sm:$0xff] (!%p1833_p7), %v1277_v1  ;;  %v1279_v3 = vld [vmem:[#allocation7 + $0x18] sm:$0xff] (!%p1833_p7)  }
  0x72   : > { %s244_s24 = scalar_lea.vmem %s1815_s3, %s1713_s8  ;;  %284 = vst [vmem:[#allocation2 + $0x10] sm:$0xff] (!%p1833_p7), %v1278_v2  ;;  %285 = vst [vmem:[#allocation2 + $0x18] sm:$0xff] (!%p1833_p7), %v1279_v3 }
  0x78 PF: > { %v1280_v4 = vld [vmem:[%s1705_s7 + $0x4] ss:$20 sps:$4 sm:$0xff]   ;;  %v1282_v5 = vld [vmem:[%s1705_s7 + $0xc] ss:$20 sps:$4 sm:$0xff]   ;;  %v1517_v6 = vmov 0   ;;  %p1115_p11 = scmp.ge.s32.totalorder %s1565_s19, 2 }
  0x79   : > { %578 = vmatprep.mubr.bf16.mxu0 %v1517_v6  ;;  %651 = vmatprep.mubr.bf16.mxu1 %v1517_v6  ;;  %v1284_v7 = vld [vmem:[%s1705_s7] ss:$20 sps:$4 sm:$0xff]   ;;  %v1285_v8 = vld [vmem:[%s1705_s7 + $0x8] ss:$20 sps:$4 sm:$0xff]   ;;  %v1291_v12 = vld [vmem:[%s1705_s7 + $0x30] ss:$20 sps:$4 sm:$0xff]  }
  0x7a   : > { %546 = vmatprep.subr.bf16.mxu0 %v1280_v4  ;;  %619 = vmatprep.subr.bf16.mxu1 %v1282_v5  ;;  %v1286_v9 = vld [vmem:[%s1705_s7 + $0x2c] ss:$20 sps:$4 sm:$0xff]   ;;  %v1288_v10 = vld [vmem:[%s1705_s7 + $0x34] ss:$20 sps:$4 sm:$0xff]   ;;  %v1294_v14 = vld [vmem:[%s1705_s7 + $0x5c] ss:$20 sps:$4 sm:$0xff]  }
  0x7b   : > { %547 = vmatpush1.bf16.msra.mxu0 %v1284_v7  ;;  %620 = vmatpush1.bf16.msra.mxu1 %v1285_v8  ;;  %v1290_v11 = vld [vmem:[%s1705_s7 + $0x28] ss:$20 sps:$4 sm:$0xff]   ;;  %v1296_v15 = vld [vmem:[%s1705_s7 + $0x50] ss:$20 sps:$4 sm:$0xff]   ;;  %v1297_v16 = vld [vmem:[%s1705_s7 + $0x58] ss:$20 sps:$4 sm:$0xff]  }
  0x7c   : > { %548 = vmatprep.subr.bf16.mxu0 %v1286_v9  ;;  %621 = vmatprep.subr.bf16.mxu1 %v1288_v10  ;;  %v1292_v13 = vld [vmem:[%s1705_s7 + $0x54] ss:$20 sps:$4 sm:$0xff]   ;;  %v1298_v17 = vld [vmem:[%s1705_s7 + $0x7c] ss:$20 sps:$4 sm:$0xff]   ;;  %v1300_v18 = vld [vmem:[%s1705_s7 + $0x84] ss:$20 sps:$4 sm:$0xff]  }
  0x7d   : > { %v1302_v19 = vld [vmem:[%s1705_s7 + $0x78] ss:$20 sps:$4 sm:$0xff]   ;;  %v1303_v20 = vld [vmem:[%s1705_s7 + $0x80] ss:$20 sps:$4 sm:$0xff]   ;;  %v1309_v24 = vld [vmem:[%s1705_s7 + $0xa8] ss:$20 sps:$4 sm:$0xff]  }
  0x7e   : > { %v1304_v21 = vld [vmem:[%s1705_s7 + $0xa4] ss:$20 sps:$4 sm:$0xff]   ;;  %v1306_v22 = vld [vmem:[%s1705_s7 + $0xac] ss:$20 sps:$4 sm:$0xff]   ;;  %v1312_v26 = vld [vmem:[%s1705_s7 + $0xd4] ss:$20 sps:$4 sm:$0xff]  }
  0x7f   : > { %549 = vmatpush1.bf16.msra.mxu0 %v1290_v11  ;;  %622 = vmatpush1.bf16.msra.mxu1 %v1291_v12  ;;  %v1308_v23 = vld [vmem:[%s1705_s7 + $0xa0] ss:$20 sps:$4 sm:$0xff]   ;;  %v1314_v27 = vld [vmem:[%s1705_s7 + $0xc8] ss:$20 sps:$4 sm:$0xff]   ;;  %v1315_v28 = vld [vmem:[%s1705_s7 + $0xd0] ss:$20 sps:$4 sm:$0xff]  }
  0x80   : > { %550 = vmatprep.subr.bf16.mxu0 %v1292_v13  ;;  %623 = vmatprep.subr.bf16.mxu1 %v1294_v14  ;;  %v1310_v25 = vld [vmem:[%s1705_s7 + $0xcc] ss:$20 sps:$4 sm:$0xff]   ;;  %v1316_v29 = vld [vmem:[%s1705_s7 + $0xf4] ss:$20 sps:$4 sm:$0xff]   ;;  %v1318_v30 = vld [vmem:[%s1705_s7 + $0xfc] ss:$20 sps:$4 sm:$0xff]  }
  0x81   : > { %v1320_v31 = vld [vmem:[%s1705_s7 + $0xf0] ss:$20 sps:$4 sm:$0xff]   ;;  %v1321_v32 = vld [vmem:[%s1705_s7 + $0xf8] ss:$20 sps:$4 sm:$0xff]   ;;  %v1327_v36 = vld [vmem:[%s1705_s7 + $0x120] ss:$20 sps:$4 sm:$0xff]  }
  0x82   : > { %v1322_v33 = vld [vmem:[%s1705_s7 + $0x11c] ss:$20 sps:$4 sm:$0xff]   ;;  %v1324_v34 = vld [vmem:[%s1705_s7 + $0x124] ss:$20 sps:$4 sm:$0xff]   ;;  %v287_v38 = vld [vmem:[#allocation2 + $0x8] sm:$0xff] }
  0x83   : > { %551 = vmatpush1.bf16.msra.mxu0 %v1296_v15  ;;  %624 = vmatpush1.bf16.msra.mxu1 %v1297_v16  ;;  %v1326_v35 = vld [vmem:[%s1705_s7 + $0x118] ss:$20 sps:$4 sm:$0xff]   ;;  %v286_v37 = vld [vmem:[#allocation2] sm:$0xff]  ;;  %v288_v39 = vld [vmem:[#allocation2 + $0x10] sm:$0xff] }
  0x84   : > { %552 = vmatprep.subr.bf16.mxu0 %v1298_v17  ;;  %625 = vmatprep.subr.bf16.mxu1 %v1300_v18  ;;  %v289_v40 = vld [vmem:[#allocation2 + $0x18] sm:$0xff]  ;;  %v1328_v41 = vld [vmem:[%s1705_s7 + $0x10] ss:$20 sps:$4 sm:$0xff]   ;;  %v1330_v43 = vld [vmem:[%s1705_s7 + $0x60] ss:$20 sps:$4 sm:$0xff]  }
  0x85   : > { %v1329_v42 = vld [vmem:[%s1705_s7 + $0x38] ss:$20 sps:$4 sm:$0xff]   ;;  %v1331_v44 = vld [vmem:[%s1705_s7 + $0x88] ss:$20 sps:$4 sm:$0xff]   ;;  %v1332_v45 = vld [vmem:[%s1705_s7 + $0xb0] ss:$20 sps:$4 sm:$0xff]  }
  0x86   : > { %v1333_v46 = vld [vmem:[%s1705_s7 + $0xd8] ss:$20 sps:$4 sm:$0xff]   ;;  %v1334_v47 = vld [vmem:[%s1705_s7 + $0x100] ss:$20 sps:$4 sm:$0xff]   ;;  %v1335_v48 = vld [vmem:[%s1705_s7 + $0x128] ss:$20 sps:$4 sm:$0xff]  }
  0x87   : > { %553 = vmatpush1.bf16.msra.mxu0 %v1302_v19  ;;  %626 = vmatpush1.bf16.msra.mxu1 %v1303_v20  ;;  %v1338_v49 = vld [vmem:[#allocation4 + $0x4] ss:$8 sps:$4 sm:$0xff]  }
  0x88   : > { %554 = vmatprep.subr.bf16.mxu0 %v1304_v21  ;;  %627 = vmatprep.subr.bf16.mxu1 %v1306_v22 }
  0x8b   : > { %555 = vmatpush1.bf16.msra.mxu0 %v1308_v23  ;;  %628 = vmatpush1.bf16.msra.mxu1 %v1309_v24 }
  0x8c   : > { %556 = vmatprep.subr.bf16.mxu0 %v1310_v25  ;;  %629 = vmatprep.subr.bf16.mxu1 %v1312_v26 }
  0x8f   : > { %557 = vmatpush1.bf16.msra.mxu0 %v1314_v27  ;;  %630 = vmatpush1.bf16.msra.mxu1 %v1315_v28 }
  0x90   : > { %558 = vmatprep.subr.bf16.mxu0 %v1316_v29  ;;  %631 = vmatprep.subr.bf16.mxu1 %v1318_v30 }
  0x93   : > { %559 = vmatpush1.bf16.msra.mxu0 %v1320_v31  ;;  %632 = vmatpush1.bf16.msra.mxu1 %v1321_v32 }
  0x94   : > { %560 = vmatprep.subr.bf16.mxu0 %v1322_v33  ;;  %633 = vmatprep.subr.bf16.mxu1 %v1324_v34  ;;  %v1336_v34 = vld [vmem:[#allocation4] ss:$8 sps:$4 sm:$0xff]  }
  0x97   : > { %561 = vmatpush1.bf16.msra.mxu0 %v1326_v35  ;;  %634 = vmatpush1.bf16.msra.mxu1 %v1327_v36  ;;  %v1339_v35 = vld [vmem:[#allocation4 + $0x14] ss:$8 sps:$4 sm:$0xff]   ;;  %v1341_v36 = vld [vmem:[#allocation4 + $0x10] ss:$8 sps:$4 sm:$0xff]  }
  0x98   : > { %1173 = vmatprep.subr.bf16.mxu0 %v1328_v41 }
  0x9a   : > { %579 = vmatmul.mubr.bf16.vlgmr.msra.gmra.mrb[0].mxu0 %v286_v37  ;;  %652 = vmatmul.mubr.bf16.vlgmr.msra.gmra.mrb[0].mxu1 %v286_v37 }
  0x9b   : > { %588 = vmatprep.mubr.bf16.mxu0 %v1517_v6  ;;  %661 = vmatprep.mubr.bf16.mxu1 %v1517_v6 }
  0x9c   : > { %1174 = vmatpush3.bf16.msra.mxu0 %v1328_v41 }
  0x9d   : > { %1175 = vmatprep.subr.bf16.mxu0 %v1329_v42 }
  0xa0   : > { %1176 = vmatpush3.bf16.msra.mxu0 %v1329_v42 }
  0xa1   : > { %1177 = vmatprep.subr.bf16.mxu0 %v1330_v43 }
  0xa2   : > { %589 = vmatmul.mubr.bf16.gmra.mrb[4].mxu0 %v287_v38  ;;  %662 = vmatmul.mubr.bf16.gmra.mrb[4].mxu1 %v287_v38 }
  0xa3   : > { %598 = vmatprep.mubr.bf16.mxu0 %v1517_v6  ;;  %671 = vmatprep.mubr.bf16.mxu1 %v1517_v6 }
  0xa4   : > { %1178 = vmatpush3.bf16.msra.mxu0 %v1330_v43 }
  0xa5   : > { %1179 = vmatprep.subr.bf16.mxu0 %v1331_v44 }
  0xa8   : > { %1180 = vmatpush3.bf16.msra.mxu0 %v1331_v44 }
  0xa9   : > { %1181 = vmatprep.subr.bf16.mxu0 %v1332_v45 }
  0xaa   : > { %599 = vmatmul.mubr.bf16.gmra.mrb[8].mxu0 %v288_v39  ;;  %672 = vmatmul.mubr.bf16.gmra.mrb[8].mxu1 %v288_v39 }
  0xab   : > { %608 = vmatprep.mubr.bf16.mxu0 %v1517_v6  ;;  %681 = vmatprep.mubr.bf16.mxu1 %v1517_v6 }
  0xac   : > { %1182 = vmatpush3.bf16.msra.mxu0 %v1332_v45 }
  0xad   : > { %1183 = vmatprep.subr.bf16.mxu0 %v1333_v46 }
  0xb0   : > { %1184 = vmatpush3.bf16.msra.mxu0 %v1333_v46 }
  0xb1   : > { %1185 = vmatprep.subr.bf16.mxu0 %v1334_v47 }
  0xb2   : > { %609 = vmatmul.mubr.bf16.gmra.mrb[12].mxu0 %v289_v40  ;;  %682 = vmatmul.mubr.bf16.gmra.mrb[12].mxu1 %v289_v40 }
  0xb3   : > { %1189 = vmatprep.mubr.bf16.mxu0 %v286_v37  ;;  %885 = vmatprep.mubr.bf16.mxu1 %v1338_v49  ;;  %v1342_v37 = vld [vmem:[#allocation4 + $0x24] ss:$8 sps:$4 sm:$0xff]  }
  0xb4   : > { %1186 = vmatpush3.bf16.msra.mxu0 %v1334_v47 }
  0xb5   : > { %1187 = vmatprep.subr.bf16.mxu0 %v1335_v48 }
  0xb8   : > { %1188 = vmatpush3.bf16.msra.mxu0 %v1335_v48 }
  0xbb   : > { %1190 = vmatmul.mubr.bf16.vlgmr.msra.gmra.mrb[16].mxu0 %v287_v38  ;;  %v1344_v38 = vld [vmem:[#allocation4 + $0x20] ss:$8 sps:$4 sm:$0xff]  }
  0xbc   : > { %1193 = vmatprep.mubr.bf16.mxu0 %v288_v39  ;;  %v1345_v39 = vld [vmem:[#allocation4 + $0x34] ss:$8 sps:$4 sm:$0xff]  }
  0xc3   : > { %1194 = vmatmul.mubr.bf16.gmra.mrb[20].mxu0 %v289_v40  ;;  %v1347_v40 = vld [vmem:[#allocation4 + $0x30] ss:$8 sps:$4 sm:$0xff]  }
 0x16d   : > { %v580_v50 = vpop.f32.mrb[0].mxu0  ;;  %v653_v51 = vpop.f32.mrb[0].mxu1 }
 0x16e   : > { %v582_v52 = vpop.f32.mrb[1].mxu0  ;;  %v655_v53 = vpop.f32.mrb[1].mxu1 }
 0x16f   : > { %v584_v54 = vpop.f32.mrb[2].mxu0  ;;  %v657_v55 = vpop.f32.mrb[2].mxu1 }
 0x170   : > { %v757_v56 = vpack.c.bf16 %v584_v54, %v580_v50  ;;  %v773_v57 = vpack.c.bf16 %v657_v55, %v653_v51  ;;  %v586_v58 = vpop.f32.mrb[3].mxu0  ;;  %v659_v59 = vpop.f32.mrb[3].mxu1 }
 0x171   : > { %v765_v60 = vpack.c.bf16 %v586_v58, %v582_v52  ;;  %v781_v61 = vpack.c.bf16 %v659_v59, %v655_v53  ;;  %v1114_v53 = vld [vmem:[%s244_s24] ss:$0 sm:$0xff] }
 0x172   : > { %1133 = vmatprep.subr.bf16.mxu1 %v773_v57 }
 0x173   : > { %1134 = vmatpush3.bf16.msra.mxu1 %v757_v56 }
 0x175   : > { %v590_v62 = vpop.f32.mrb[4].mxu0  ;;  %v663_v63 = vpop.f32.mrb[4].mxu1 }
 0x176   : > { %v592_v0 = vpop.f32.mrb[5].mxu0  ;;  %v665_v1 = vpop.f32.mrb[5].mxu1 }
 0x177   : > { %v594_v2 = vpop.f32.mrb[6].mxu0  ;;  %v667_v3 = vpop.f32.mrb[6].mxu1 }
 0x178   : > { %v758_v4 = vpack.c.bf16 %v594_v2, %v590_v62  ;;  %v774_v5 = vpack.c.bf16 %v667_v3, %v663_v63  ;;  %v596_v6 = vpop.f32.mrb[7].mxu0  ;;  %v669_v7 = vpop.f32.mrb[7].mxu1 }
 0x179   : > { %v766_v8 = vpack.c.bf16 %v596_v6, %v592_v0  ;;  %v782_v9 = vpack.c.bf16 %v669_v7, %v665_v1 }
 0x17a   : > { %1135 = vmatprep.subr.bf16.mxu1 %v774_v5 }
 0x17b   : > { %1136 = vmatpush3.bf16.msra.mxu1 %v758_v4 }
 0x17d   : > { %v600_v10 = vpop.f32.mrb[8].mxu0  ;;  %v673_v11 = vpop.f32.mrb[8].mxu1 }
 0x17e   : > { %v602_v12 = vpop.f32.mrb[9].mxu0  ;;  %v675_v13 = vpop.f32.mrb[9].mxu1 }
 0x17f   : > { %v604_v14 = vpop.f32.mrb[10].mxu0  ;;  %v677_v15 = vpop.f32.mrb[10].mxu1 }
 0x180   : > { %v759_v16 = vpack.c.bf16 %v604_v14, %v600_v10  ;;  %v775_v17 = vpack.c.bf16 %v677_v15, %v673_v11  ;;  %v606_v18 = vpop.f32.mrb[11].mxu0  ;;  %v679_v19 = vpop.f32.mrb[11].mxu1 }
 0x181   : > { %v767_v20 = vpack.c.bf16 %v606_v18, %v602_v12  ;;  %v783_v21 = vpack.c.bf16 %v679_v19, %v675_v13 }
 0x182   : > { %1137 = vmatprep.subr.bf16.mxu1 %v775_v17 }
 0x183   : > { %1138 = vmatpush3.bf16.msra.mxu1 %v759_v16 }
 0x185   : > { %v610_v22 = vpop.f32.mrb[12].mxu0  ;;  %v683_v23 = vpop.f32.mrb[12].mxu1 }
 0x186   : > { %v612_v24 = vpop.f32.mrb[13].mxu0  ;;  %v685_v25 = vpop.f32.mrb[13].mxu1 }
 0x187   : > { %v614_v26 = vpop.f32.mrb[14].mxu0  ;;  %v687_v27 = vpop.f32.mrb[14].mxu1 }
 0x188   : > { %v760_v28 = vpack.c.bf16 %v614_v26, %v610_v22  ;;  %v776_v29 = vpack.c.bf16 %v687_v27, %v683_v23  ;;  %v616_v30 = vpop.f32.mrb[15].mxu0  ;;  %v689_v31 = vpop.f32.mrb[15].mxu1 }
 0x189   : > { %v768_v32 = vpack.c.bf16 %v616_v30, %v612_v24  ;;  %v784_v33 = vpack.c.bf16 %v689_v31, %v685_v25 }
 0x18a   : > { %1139 = vmatprep.subr.bf16.mxu1 %v776_v29 }
 0x18b   : > { %1140 = vmatpush3.bf16.msra.mxu1 %v760_v28 }
 0x18c   : > { %1141 = vmatprep.subr.bf16.mxu1 %v781_v61 }
 0x18e   : > { %v1191_v41 = vpop.f32.mrb[16].mxu0 }
 0x18f   : > { %1142 = vmatpush3.bf16.msra.mxu1 %v765_v60  ;;  %v726_v42 = vpop.f32.mrb[17].mxu0 }
 0x190   : > { %1143 = vmatprep.subr.bf16.mxu1 %v782_v9  ;;  %v1192_v43 = vpop.f32.mrb[18].mxu0 }
 0x191   : > { %v729_v44 = vpop.f32.mrb[19].mxu0 }
 0x193   : > { %1144 = vmatpush3.bf16.msra.mxu1 %v766_v8 }
 0x194   : > { %1145 = vmatprep.subr.bf16.mxu1 %v783_v21 }
 0x196   : > { %v1195_v45 = vpop.f32.mrb[20].mxu0 }
 0x197   : > { %1146 = vmatpush3.bf16.msra.mxu1 %v767_v20  ;;  %v742_v46 = vpop.f32.mrb[21].mxu0 }
 0x198   : > { %1147 = vmatprep.subr.bf16.mxu1 %v784_v33  ;;  %v1196_v47 = vpop.f32.mrb[22].mxu0 }
 0x199   : > { %v745_v48 = vpop.f32.mrb[23].mxu0 }
 0x19b   : > { %1148 = vmatpush3.bf16.msra.mxu1 %v768_v32 }
 0x19e   : > { %886 = vmatmul.mubr.bf16.vlgmr.msra.gmra.mrb[16].mxu1 %v1336_v34 }
 0x19f   : > { %893 = vmatprep.mubr.bf16.mxu1 %v1339_v35 }
 0x1a6   : > { %894 = vmatmul.mubr.bf16.gmra.mrb[20].mxu1 %v1341_v36 }
 0x1a7   : > { %901 = vmatprep.mubr.bf16.mxu1 %v1342_v37 }
 0x1ae   : > { %902 = vmatmul.mubr.bf16.gmra.mrb[24].mxu1 %v1344_v38 }
 0x1af   : > { %909 = vmatprep.mubr.bf16.mxu1 %v1345_v39 }
 0x1b6   : > { %910 = vmatmul.mubr.bf16.gmra.mrb[28].mxu1 %v1347_v40 }
 0x271   : > { %v1149_v49 = vpop.f32.mrb[16].mxu1 }
 0x272   : > { %v1150_v50 = vpop.f32.mrb[17].mxu1 }
 0x273   : > { %v1151_v51 = vadd.f32 %v1150_v50, %v1149_v49  ;;  %v1152_v52 = vpop.f32.mrb[18].mxu1 }
 0x274   : > { %v1153_v54 = vpop.f32.mrb[19].mxu1 }
 0x275   : > { %v888_v55 = vadd.f32 %v1151_v51, %v726_v42  ;;  %v1154_v56 = vadd.f32 %v1153_v54, %v1152_v52 }
 0x277   : > { %v925_v57 = vadd.f32 %v1114_v53, %v888_v55  ;;  %v891_v58 = vadd.f32 %v1154_v56, %v729_v44 }
 0x279   : > { %v926_v59 = vadd.f32 %v1114_v53, %v891_v58  ;;  %v1155_v60 = vpop.f32.mrb[20].mxu1  ;;  %v937_v26 = vmax.f32 (!%p1115_p11), %v925_v57, 0.0 }
 0x27a   : > { %v1156_v61 = vpop.f32.mrb[21].mxu1 }
 0x27b   : > { %v1157_v62 = vadd.f32 %v1156_v61, %v1155_v60  ;;  %v1158_v63 = vpop.f32.mrb[22].mxu1  ;;  %v938_v27 = vmax.f32 (!%p1115_p11), %v926_v59, 0.0 }
 0x27c   : > { %v1159_v0 = vpop.f32.mrb[23].mxu1 }
 0x27d   : > { %v896_v1 = vadd.f32 %v1191_v41, %v1157_v62  ;;  %v1160_v2 = vadd.f32 %v1159_v0, %v1158_v63  ;;  %v945_v34 = vpack.c.bf16 (!%p1115_p11), %v938_v27, %v937_v26 }
 0x27f   : > { %v927_v3 = vadd.f32 %v1114_v53, %v896_v1  ;;  %v899_v4 = vadd.f32 %v1192_v43, %v1160_v2  ;;  %949 = vst [vmem:[#allocation2] sm:$0xff] (!%p1115_p11), %v945_v34 }
 0x281   : > { %v928_v5 = vadd.f32 %v1114_v53, %v899_v4  ;;  %v1161_v6 = vpop.f32.mrb[24].mxu1  ;;  %v939_v28 = vmax.f32 (!%p1115_p11), %v927_v3, 0.0 }
 0x282   : > { %v1162_v7 = vpop.f32.mrb[25].mxu1 }
 0x283   : > { %v1163_v8 = vadd.f32 %v1162_v7, %v1161_v6  ;;  %v1164_v9 = vpop.f32.mrb[26].mxu1  ;;  %v940_v29 = vmax.f32 (!%p1115_p11), %v928_v5, 0.0 }
 0x284   : > { %v1165_v10 = vpop.f32.mrb[27].mxu1 }
 0x285   : > { %v904_v11 = vadd.f32 %v1163_v8, %v742_v46  ;;  %v1166_v12 = vadd.f32 %v1165_v10, %v1164_v9  ;;  %v946_v35 = vpack.c.bf16 (!%p1115_p11), %v940_v29, %v939_v28 }
 0x287   : > { %v929_v13 = vadd.f32 %v1114_v53, %v904_v11  ;;  %v907_v14 = vadd.f32 %v1166_v12, %v745_v48  ;;  %950 = vst [vmem:[#allocation2 + $0x8] sm:$0xff] (!%p1115_p11), %v946_v35 }
 0x289   : > { %v930_v15 = vadd.f32 %v1114_v53, %v907_v14  ;;  %v1167_v16 = vpop.f32.mrb[28].mxu1  ;;  %v941_v30 = vmax.f32 (!%p1115_p11), %v929_v13, 0.0 }
 0x28a   : > { %v1168_v17 = vpop.f32.mrb[29].mxu1 }
 0x28b   : > { %v1169_v18 = vadd.f32 %v1168_v17, %v1167_v16  ;;  %v1170_v19 = vpop.f32.mrb[30].mxu1  ;;  %936 = sbr.rel (%p1115_p11) target bundleno = 664 (0x298), region = 56  ;;  %v942_v31 = vmax.f32 (!%p1115_p11), %v930_v15, 0.0 }
 0x28c   : > { %v1171_v20 = vpop.f32.mrb[31].mxu1 }
 0x28d   : > { %v912_v21 = vadd.f32 %v1195_v45, %v1169_v18  ;;  %v1172_v22 = vadd.f32 %v1171_v20, %v1170_v19  ;;  %v947_v36 = vpack.c.bf16 (!%p1115_p11), %v942_v31, %v941_v30 }
 0x28f   : > { %v931_v23 = vadd.f32 %v1114_v53, %v912_v21  ;;  %v915_v24 = vadd.f32 %v1196_v47, %v1172_v22  ;;  %951 = vst [vmem:[#allocation2 + $0x10] sm:$0xff] (!%p1115_p11), %v947_v36 }
 0x291   : > { %v932_v25 = vadd.f32 %v1114_v53, %v915_v24  ;;  %v943_v32 = vmax.f32 (!%p1115_p11), %v931_v23, 0.0 }
 0x293   : > { %v944_v33 = vmax.f32 %v932_v25, 0.0 }
 0x295   : > { %v948_v37 = vpack.c.bf16 %v944_v33, %v943_v32 }
 0x297   : > { %952 = vst [vmem:[#allocation2 + $0x18] sm:$0xff] %v948_v37 }
 0x298 PF: > { %p1116_p13 = scmp.ne.s32.totalorder %s1565_s19, 2 }
 0x299   : > { %957 = vst [vmem:[#allocation10] sm:$0xff] (!%p1116_p13), %v925_v57  ;;  %958 = vst [vmem:[#allocation10 + $0x8] sm:$0xff] (!%p1116_p13), %v926_v59 }
 0x29a   : > { %956 = sbr.rel (%p1116_p13) target bundleno = 673 (0x2a1), region = 60  ;;  %959 = vst [vmem:[#allocation10 + $0x10] sm:$0xff] (!%p1116_p13), %v927_v3  ;;  %960 = vst [vmem:[#allocation10 + $0x18] sm:$0xff] (!%p1116_p13), %v928_v5 }
 0x29b   : > { %961 = vst [vmem:[#allocation10 + $0x20] sm:$0xff] (!%p1116_p13), %v929_v13  ;;  %962 = vst [vmem:[#allocation10 + $0x28] sm:$0xff] (!%p1116_p13), %v930_v15 }
 0x29c   : > { %963 = vst [vmem:[#allocation10 + $0x30] sm:$0xff] (!%p1116_p13), %v931_v23  ;;  %964 = vst [vmem:[#allocation10 + $0x38] sm:$0xff] (!%p1116_p13), %v932_v25 }
 0x2a1 PF: > { %p1230_p12 = scmp.eq.s32.totalorder %s1565_s19, 2  ;;  %s1518_s10 = smov [#allocation10]  }
 0x2a2   : > { %s971_s28 = sshll.u32 %s1518_s10, 4  ;;  %s972_s28 = int_to_ptr.vmem [resolvable:$true] %s971_s28 }
 0x2a3   : > { %s1434_s11 = scalar_lea.vmem %s972_s28, 1024  ;;  %p1441_p5 = scmp.lt.s32.totalorder %s972_s28, %s972_s28 }
 0x2a4   : > { %p1435_p8 = scmp.ne.s32.totalorder %s972_s28, %s1434_s11  ;;  %p1442_p9 = scmp.lt.s32.totalorder %s1434_s11, %s1434_s11 }
 0x2a6   : > { %p1436_p10 = pnand %p1435_p8, %p1230_p12  ;;  %p1443_p1 = por %p1442_p9, %p1441_p5 }
 0x2a8   : > { %p1437_p0 = pneg %p1436_p10 }
 0x2aa   : > { %p1444_p3 = pnand %p1443_p1, %p1437_p0 }
 0x2ac   : > { %1447 = shalt.err (!%p1444_p3)
}
 0x2ad   : > { %s1448_s14 = scalar_lea.hbm %s1816_s4, 1024 }
 0x2ae   : > { %p1449_p6 = scmp.ne.s32.totalorder %s1816_s4, %s1448_s14  ;;  %p1454_p7 = scmp.lt.u32.totalorder %s1448_s14, %s1816_s4 }
 0x2b0   : > { %p1450_p2 = pnand %p1449_p6, %p1230_p12 }
 0x2b2   : > { %p1451_p4 = pneg %p1450_p2 }
 0x2b4   : > { %p1456_p11 = pnand %p1454_p7, %p1451_p4 }
 0x2b6   : > { %1459 = shalt.err (!%p1456_p11)
}
 0x2b7   : > { %s1519_s30 = smov 128   ;;  %s1520_s5 = smov 8  }
 0x2b8   : > { %1211 = dma.vmem_to_hbm [thread:$0]  (%p1230_p12), %s972_s28, 1024, %s1816_s4, [#allocation6], %s1519_s30, %s1519_s30, %s1520_s5  }
 0x2b9   : > { %1489 = dma.done.wait (%p1230_p12), [#allocation6], 1024  }
 0x2ba   : > { %1491 = vsyncadd (%p1230_p12), [#allocation6], 4294966272 }
 0x2bb PF: > { %p14_p13 = scmp.ge.s32.totalorder %s1568_s20, 5   ;;  %s1834_s15 = smov %s1498_s16 }
 0x2bc   : > { %s1835_s16 = smov %s1502_s17  ;;  %s1836_s17 = smov %s1578_s23 }
 0x2bd   : > { %s1837_s18 = smov %s1568_s20  ;;  %16 = sbr.rel (!%p14_p13) target bundleno = 4 (0x4), region = 95 }
 0x2c4   :  { %987 = vsyncpa [#allocation5], 1 }
 0x2c5   :  { %989 = vsyncpa [#allocation5 + $0x1], 1 }
 0x2c6   :  { %990 = vsyncpa [#allocation8], 1 }
 0x2c7   :  { %991 = vsyncpa [#allocation6], 1 }
 0x2c8   :  { %993 = vsyncpa [#allocation6 + $0x1], 1 }

</bundles_post_ra>
